<compile_context>
chip_gen: v6e
topology: v6e:2x2x1
jax: 0.10.0
libtpu: 0.0.40
codegen_flags: <defaults>
</compile_context>

<pallas_src>
import functools
import numpy as np
import jax
import jax.numpy as jnp
from jax import lax
from jax.experimental import pallas as pl
from jax.experimental.pallas import tpu as pltpu

LANES = 128
NUM_CORES = 2  # leading "parallel" axis -> 2 partial outputs (v7x dual TC)


def harmonic_kernel(off_ref, lo_ref, hi_ref,               # scalar prefetch (SMEM, i32)
                    dx_ref, dy_ref, dz_ref, x0_ref, k_ref,  # (rows,128) f32 VMEM blocks
                    out_ref):                               # (8, b_pad) f32 accumulator
    c = pl.program_id(0)                    # core / partial-output index ("parallel")
    i = pl.program_id(1)                    # chunk index (reduction axis, "arbitrary")
    n_chunks_per_core = pl.num_programs(1)
    rows, lanes = dx_ref.shape
    chunk = rows * lanes
    g = c * n_chunks_per_core + i           # global chunk index

    @pl.when(i == 0)
    def _():
        out_ref[...] = jnp.zeros_like(out_ref)

    # harmonic energy per interaction: k * (|r_i - r_j| - x0)^2   (V0 == 0)
    # NOTE: forward-only; a backward pass would need an epsilon guard on sqrt(0).
    dx = dx_ref[...]
    dy = dy_ref[...]
    dz = dz_ref[...]
    d = jnp.sqrt(dx * dx + dy * dy + dz * dz)
    diff = d - x0_ref[...]
    e = k_ref[...] * diff * diff                             # (rows, 128)

    # flat (sorted) interaction index of every element in this chunk
    ridx = lax.broadcasted_iota(jnp.int32, (rows, lanes), 0)
    lidx = lax.broadcasted_iota(jnp.int32, (rows, lanes), 1)
    gidx = g * chunk + ridx * lanes + lidx

    lane_ids = lax.broadcasted_iota(jnp.int32, out_ref.shape, 1)

    def body(b, acc):
        seg_lo = off_ref[b]
        seg_hi = off_ref[b + 1]
        masked = jnp.where((gidx >= seg_lo) & (gidx < seg_hi), e, 0.0)
        contrib = jnp.sum(jnp.sum(masked, axis=0, keepdims=True),
                          axis=1, keepdims=True)             # (1, 1)
        return acc + jnp.where(lane_ids == b, contrib, 0.0)

    # Data is sorted by structure, so only visit the segments overlapping this
    # chunk (dynamic fori bounds from SMEM); empty/padding chunks do 0 iters.
    acc = lax.fori_loop(lo_ref[g], hi_ref[g] + 1, body,
                        jnp.zeros(out_ref.shape, jnp.float32))
    out_ref[...] += acc


@functools.partial(jax.jit, static_argnames=("n_structures", "chunk_rows"))
def harmonic_energy(pos, mapping, mapping_batch, atom_types,
                    x0_table, k_table, n_structures, chunk_rows=32):
    """pos: (n_atoms, 3) f32, mapping: (2, N) i32, mapping_batch: (N,) i32,
    atom_types: (n_atoms,) i32, x0_table/k_table: (T, T) f32."""
    n_int = mapping.shape[1]
    chunk = chunk_rows * LANES

    # --- glue: sort interactions by structure, gather params / pair deltas ---
    order = jnp.argsort(mapping_batch)
    i0 = mapping[0][order]
    i1 = mapping[1][order]
    t0 = atom_types[i0]
    t1 = atom_types[i1]
    x0 = x0_table[t0, t1]                      # (N,)
    k = k_table[t0, t1]                        # (N,)
    delta = pos[i0] - pos[i1]                  # (N, 3)

    # per-structure segment offsets into the sorted interaction list
    counts = jnp.bincount(mapping_batch, length=n_structures)
    offsets = jnp.concatenate([jnp.zeros((1,), jnp.int32),
                               jnp.cumsum(counts).astype(jnp.int32)])

    # --- pad & pack lane+sublane dense: (total_rows, 128) per stream ---
    n_chunks = max(1, -(-n_int // chunk))
    n_chunks_per_core = -(-n_chunks // NUM_CORES)
    n_chunks = NUM_CORES * n_chunks_per_core
    n_pad = n_chunks * chunk
    total_rows = n_chunks * chunk_rows

    def pack(v):
        return jnp.pad(v.astype(jnp.float32),
                       (0, n_pad - n_int)).reshape(total_rows, LANES)

    dx = pack(delta[:, 0])
    dy = pack(delta[:, 1])
    dz = pack(delta[:, 2])
    x0p = pack(x0)
    kp = pack(k)                               # padded lanes have k == 0 -> 0 energy

    # per-chunk range of structures present (kernel loop only visits those)
    starts = jnp.arange(n_chunks, dtype=jnp.int32) * chunk
    ends = starts + (chunk - 1)
    chunk_lo = (jnp.searchsorted(offsets, starts, side="right") - 1).astype(jnp.int32)
    chunk_hi = jnp.clip(jnp.searchsorted(offsets, ends, side="right") - 1,
                        0, n_structures - 1).astype(jnp.int32)

    b_pad = max(LANES, -(-n_structures // LANES) * LANES)   # no silent drop if B > 128

    idx_map = lambda c, i, off, lo, hi: (c * n_chunks_per_core + i, 0)
    out = pl.pallas_call(
        harmonic_kernel,
        out_shape=jax.ShapeDtypeStruct((NUM_CORES * 8, b_pad), jnp.float32),
        grid_spec=pltpu.PrefetchScalarGridSpec(
            num_scalar_prefetch=3,
            grid=(NUM_CORES, n_chunks_per_core),
            in_specs=[pl.BlockSpec((chunk_rows, LANES), idx_map)] * 5,
            out_specs=pl.BlockSpec((8, b_pad), lambda c, i, off, lo, hi: (c, 0)),
        ),
        compiler_params=pltpu.CompilerParams(
            dimension_semantics=("parallel", "arbitrary"),
            vmem_limit_bytes=32 << 20),
    )(offsets, chunk_lo, chunk_hi, dx, dy, dz, x0p, kp)

    # add the per-core partials (row 0 of each core's 8-row output block)
    partials = out[0::8, :]                    # (NUM_CORES, b_pad)
    return jnp.sum(partials, axis=0)[:n_structures]


if __name__ == "__main__":
    # ----- deterministic setup (mirrors Harmonic.__init__ with name="bonds") -----
    n_types = 4          # atom types 0..3 -> x_0, k tables of shape (4, 4)
    n_atoms = 10
    n_interactions = 16  # number of bonds
    n_structures = 2     # batch size for the scatter-sum

    # statistics dict -> dense parameter tables (same fill logic as __init__)
    x0_table_np = np.zeros((n_types, n_types), dtype=np.float32)
    k_table_np = np.zeros((n_types, n_types), dtype=np.float32)
    for i in range(n_types):
        for j in range(n_types):
            x0_table_np[i, j] = 1.0 + 0.1 * (i + j)      # statistics[(i,j)]["x_0"]
            k_table_np[i, j] = 0.5 * (i + 1) * (j + 1)   # statistics[(i,j)]["k"]

    key = jax.random.PRNGKey(0)
    k_pos, k_types, k_map, k_batch = jax.random.split(key, 4)

    pos = jax.random.normal(k_pos, (n_atoms, 3), dtype=jnp.float32)
    atom_types = jax.random.randint(k_types, (n_atoms,), 0, n_types, dtype=jnp.int32)
    # random bond index mapping (2, N); ensure i != j
    m0 = jax.random.randint(k_map, (n_interactions,), 0, n_atoms, dtype=jnp.int32)
    m1 = (m0 + 1 + jnp.arange(n_interactions, dtype=jnp.int32) % (n_atoms - 1)) % n_atoms
    mapping = jnp.stack([m0, m1], axis=0)
    # arbitrary (unsorted) structure assignment — exercises the wrapper-side sort
    mapping_batch = jax.random.randint(k_batch, (n_interactions,), 0, n_structures,
                                       dtype=jnp.int32)

    x0_table = jnp.asarray(x0_table_np)
    k_table = jnp.asarray(k_table_np)

    energy = harmonic_energy(pos, mapping, mapping_batch, atom_types,
                             x0_table, k_table, n_structures=n_structures)
    energy = jax.block_until_ready(energy)

    # ----- plain numpy reference of the PyTorch forward -----
    pos_np = np.asarray(pos)
    map_np = np.asarray(mapping)
    types_np = np.asarray(atom_types)
    batch_np = np.asarray(mapping_batch)
    d_np = np.linalg.norm(pos_np[map_np[0]] - pos_np[map_np[1]], axis=-1)
    x0_np = x0_table_np[types_np[map_np[0]], types_np[map_np[1]]]
    kk_np = k_table_np[types_np[map_np[0]], types_np[map_np[1]]]
    y_np = kk_np * (d_np - x0_np) ** 2
    ref = np.zeros(n_structures, dtype=np.float32)
    np.add.at(ref, batch_np, y_np)

    if not np.allclose(np.asarray(energy), ref, rtol=1e-5, atol=1e-5):
        raise AssertionError(f"mismatch: kernel={np.asarray(energy)} ref={ref}")
    print("KERNEL_OK")
</pallas_src>

<mosaic_0001>
module attributes {stable_mosaic.version = 11 : i64} {
  func.func private @main(%arg0: i32) attributes {dimension_semantics = [#tpu.dimension_semantics<core_parallel>], iteration_bounds = array<i64: 2>, tpu.core_type = #tpu.core_type<sc_scalar_subcore>, window_params = []} {
    return
  }
}

module attributes {stable_mosaic.version = 11 : i64} {
  func.func private @main(%arg0: i32) attributes {dimension_semantics = [#tpu.dimension_semantics<core_parallel>], iteration_bounds = array<i64: 2>, tpu.core_type = #tpu.core_type<sc_scalar_subcore>, window_params = []} {
    return
  }
}

module attributes {stable_mosaic.version = 11 : i64} {
  func.func @harmonic_kernel(%arg0: i32, %arg1: i32, %arg2: memref<3xi32, #tpu.memory_space<smem>>, %arg3: memref<2xi32, #tpu.memory_space<smem>>, %arg4: memref<2xi32, #tpu.memory_space<smem>>, %arg5: memref<32x128xf32, #tpu.memory_space<vmem>>, %arg6: memref<32x128xf32, #tpu.memory_space<vmem>>, %arg7: memref<32x128xf32, #tpu.memory_space<vmem>>, %arg8: memref<32x128xf32, #tpu.memory_space<vmem>>, %arg9: memref<32x128xf32, #tpu.memory_space<vmem>>, %arg10: memref<8x128xf32, #tpu.memory_space<vmem>>) attributes {dimension_semantics = [#tpu.dimension_semantics<parallel>, #tpu.dimension_semantics<arbitrary>], iteration_bounds = array<i64: 2, 1>, scalar_prefetch = 3 : i64, scratch_operands = 0 : i64, tpu.core_type = #tpu.core_type<tc>, window_params = [{transform_indices = @transform_0, window_bounds = array<i64: 32, 128>}, {transform_indices = @transform_1, window_bounds = array<i64: 32, 128>}, {transform_indices = @transform_2, window_bounds = array<i64: 32, 128>}, {transform_indices = @transform_3, window_bounds = array<i64: 32, 128>}, {transform_indices = @transform_4, window_bounds = array<i64: 32, 128>}, {transform_indices = @transform_5, window_bounds = array<i64: 8, 128>}]} {
    %c1_i32 = arith.constant 1 : i32
    %0 = arith.muli %arg0, %c1_i32 : i32
    %1 = arith.addi %0, %arg1 : i32
    %c0_i32 = arith.constant 0 : i32
    %2 = arith.cmpi eq, %arg1, %c0_i32 : i32
    %3 = arith.extui %2 : i1 to i32
    %c0_i32_0 = arith.constant 0 : i32
    %4 = arith.cmpi ne, %3, %c0_i32_0 : i32
    scf.if %4 {
      %cst_16 = arith.constant 0.000000e+00 : f32
      %40 = vector.broadcast %cst_16 : f32 to vector<8x128xf32>
      %c0_17 = arith.constant 0 : index
      %c0_18 = arith.constant 0 : index
      %41 = vector.load %arg10[%c0_17, %c0_18] : memref<8x128xf32, #tpu.memory_space<vmem>>, vector<8x128xf32>
      tpu.vector_store %arg10[%c0_17, %c0_18], %40 {strides = array<i32>} : memref<8x128xf32, #tpu.memory_space<vmem>>, vector<8x128xf32>,
    } else {
    }
    %c0 = arith.constant 0 : index
    %c0_1 = arith.constant 0 : index
    %5 = vector.load %arg5[%c0, %c0_1] : memref<32x128xf32, #tpu.memory_space<vmem>>, vector<32x128xf32>
    %c0_2 = arith.constant 0 : index
    %c0_3 = arith.constant 0 : index
    %6 = vector.load %arg6[%c0_2, %c0_3] : memref<32x128xf32, #tpu.memory_space<vmem>>, vector<32x128xf32>
    %c0_4 = arith.constant 0 : index
    %c0_5 = arith.constant 0 : index
    %7 = vector.load %arg7[%c0_4, %c0_5] : memref<32x128xf32, #tpu.memory_space<vmem>>, vector<32x128xf32>
    %8 = arith.mulf %5, %5 : vector<32x128xf32>
    %9 = arith.mulf %6, %6 : vector<32x128xf32>
    %10 = arith.addf %8, %9 : vector<32x128xf32>
    %11 = arith.mulf %7, %7 : vector<32x128xf32>
    %12 = arith.addf %10, %11 : vector<32x128xf32>
    %13 = math.sqrt %12 : vector<32x128xf32>
    %c0_6 = arith.constant 0 : index
    %c0_7 = arith.constant 0 : index
    %14 = vector.load %arg8[%c0_6, %c0_7] : memref<32x128xf32, #tpu.memory_space<vmem>>, vector<32x128xf32>
    %15 = arith.subf %13, %14 : vector<32x128xf32>
    %c0_8 = arith.constant 0 : index
    %c0_9 = arith.constant 0 : index
    %16 = vector.load %arg9[%c0_8, %c0_9] : memref<32x128xf32, #tpu.memory_space<vmem>>, vector<32x128xf32>
    %17 = arith.mulf %16, %15 : vector<32x128xf32>
    %18 = arith.mulf %17, %15 : vector<32x128xf32>
    %19 = tpu.iota {dimensions = array<i32: 0>} : vector<32x128xi32>
    %20 = tpu.iota {dimensions = array<i32: 1>} : vector<32x128xi32>
    %c4096_i32 = arith.constant 4096 : i32
    %21 = arith.muli %1, %c4096_i32 : i32
    %c128_i32 = arith.constant 128 : i32
    %22 = vector.broadcast %c128_i32 : i32 to vector<32x128xi32>
    %23 = arith.muli %19, %22 : vector<32x128xi32>
    %24 = vector.broadcast %21 : i32 to vector<32x128xi32>
    %25 = arith.addi %24, %23 : vector<32x128xi32>
    %26 = arith.addi %25, %20 : vector<32x128xi32>
    %27 = tpu.iota {dimensions = array<i32: 1>} : vector<8x128xi32>
    %28 = arith.index_cast %1 : i32 to index
    %29 = memref.load %arg3[%28] : memref<2xi32, #tpu.memory_space<smem>>
    %30 = arith.index_cast %1 : i32 to index
    %31 = memref.load %arg4[%30] : memref<2xi32, #tpu.memory_space<smem>>
    %c1_i32_10 = arith.constant 1 : i32
    %32 = arith.addi %31, %c1_i32_10 : i32
    %cst = arith.constant 0.000000e+00 : f32
    %33 = vector.broadcast %cst : f32 to vector<8x128xf32>
    %34 = arith.subi %32, %29 : i32
    %35 = arith.addi %29, %34 : i32
    %c1_i32_11 = arith.constant 1 : i32
    %36 = scf.for %arg11 = %29 to %35 step %c1_i32_11 iter_args(%arg12 = %33) -> (vector<8x128xf32>)  : i32 {
      %40 = arith.index_cast %arg11 : i32 to index
      %41 = memref.load %arg2[%40] : memref<3xi32, #tpu.memory_space<smem>>
      %c1_i32_16 = arith.constant 1 : i32
      %42 = arith.addi %arg11, %c1_i32_16 : i32
      %43 = arith.index_cast %42 : i32 to index
      %44 = memref.load %arg2[%43] : memref<3xi32, #tpu.memory_space<smem>>
      %45 = vector.broadcast %41 : i32 to vector<32x128xi32>
      %46 = arith.cmpi sge, %26, %45 : vector<32x128xi32>
      %47 = vector.broadcast %44 : i32 to vector<32x128xi32>
      %48 = arith.cmpi slt, %26, %47 : vector<32x128xi32>
      %49 = arith.andi %46, %48 : vector<32x128xi1>
      %cst_17 = arith.constant 0.000000e+00 : f32
      %50 = vector.broadcast %cst_17 : f32 to vector<32x128xf32>
      %51 = arith.select %49, %18, %50 : vector<32x128xi1>, vector<32x128xf32>
      %cst_18 = arith.constant dense<0.000000e+00> : vector<128xf32>
      %52 = vector.multi_reduction <add>, %51, %cst_18 [0] : vector<32x128xf32> to vector<128xf32>
      %53 = vector.shape_cast %52 : vector<128xf32> to vector<1x128xf32>
      %cst_19 = arith.constant dense<0.000000e+00> : vector<1xf32>
      %54 = vector.multi_reduction <add>, %53, %cst_19 [1] : vector<1x128xf32> to vector<1xf32>
      %55 = vector.shape_cast %54 : vector<1xf32> to vector<1x1xf32>
      %56 = vector.broadcast %arg11 : i32 to vector<8x128xi32>
      %57 = arith.cmpi eq, %27, %56 : vector<8x128xi32>
      %cst_20 = arith.constant 0.000000e+00 : f32
      %58 = vector.shape_cast %55 : vector<1x1xf32> to vector<1x1xf32>
      %59 = vector.broadcast %58 : vector<1x1xf32> to vector<8x128xf32>
      %60 = vector.broadcast %cst_20 : f32 to vector<8x128xf32>
      %61 = arith.select %57, %59, %60 : vector<8x128xi1>, vector<8x128xf32>
      %62 = arith.addf %arg12, %61 : vector<8x128xf32>
      scf.yield %62 : vector<8x128xf32>
    }
    %c0_12 = arith.constant 0 : index
    %c0_13 = arith.constant 0 : index
    %37 = vector.load %arg10[%c0_12, %c0_13] : memref<8x128xf32, #tpu.memory_space<vmem>>, vector<8x128xf32>
    %38 = arith.addf %37, %36 : vector<8x128xf32>
    %c0_14 = arith.constant 0 : index
    %c0_15 = arith.constant 0 : index
    %39 = vector.load %arg10[%c0_14, %c0_15] : memref<8x128xf32, #tpu.memory_space<vmem>>, vector<8x128xf32>
    tpu.vector_store %arg10[%c0_14, %c0_15], %38 {strides = array<i32>} : memref<8x128xf32, #tpu.memory_space<vmem>>, vector<8x128xf32>,
    return
  }
  func.func @transform_0(%arg0: i32, %arg1: i32, %arg2: memref<3xi32, #tpu.memory_space<smem>>, %arg3: memref<2xi32, #tpu.memory_space<smem>>, %arg4: memref<2xi32, #tpu.memory_space<smem>>) -> (i32, i32) {
    %c1_i32 = arith.constant 1 : i32
    %0 = arith.muli %arg0, %c1_i32 : i32
    %1 = arith.addi %0, %arg1 : i32
    %c0_i32 = arith.constant 0 : i32
    %c0_i32_0 = arith.constant 0 : i32
    return %1, %c0_i32 : i32, i32
  }
  func.func @transform_1(%arg0: i32, %arg1: i32, %arg2: memref<3xi32, #tpu.memory_space<smem>>, %arg3: memref<2xi32, #tpu.memory_space<smem>>, %arg4: memref<2xi32, #tpu.memory_space<smem>>) -> (i32, i32) {
    %c1_i32 = arith.constant 1 : i32
    %0 = arith.muli %arg0, %c1_i32 : i32
    %1 = arith.addi %0, %arg1 : i32
    %c0_i32 = arith.constant 0 : i32
    %c0_i32_0 = arith.constant 0 : i32
    return %1, %c0_i32 : i32, i32
  }
  func.func @transform_2(%arg0: i32, %arg1: i32, %arg2: memref<3xi32, #tpu.memory_space<smem>>, %arg3: memref<2xi32, #tpu.memory_space<smem>>, %arg4: memref<2xi32, #tpu.memory_space<smem>>) -> (i32, i32) {
    %c1_i32 = arith.constant 1 : i32
    %0 = arith.muli %arg0, %c1_i32 : i32
    %1 = arith.addi %0, %arg1 : i32
    %c0_i32 = arith.constant 0 : i32
    %c0_i32_0 = arith.constant 0 : i32
    return %1, %c0_i32 : i32, i32
  }
  func.func @transform_3(%arg0: i32, %arg1: i32, %arg2: memref<3xi32, #tpu.memory_space<smem>>, %arg3: memref<2xi32, #tpu.memory_space<smem>>, %arg4: memref<2xi32, #tpu.memory_space<smem>>) -> (i32, i32) {
    %c1_i32 = arith.constant 1 : i32
    %0 = arith.muli %arg0, %c1_i32 : i32
    %1 = arith.addi %0, %arg1 : i32
    %c0_i32 = arith.constant 0 : i32
    %c0_i32_0 = arith.constant 0 : i32
    return %1, %c0_i32 : i32, i32
  }
  func.func @transform_4(%arg0: i32, %arg1: i32, %arg2: memref<3xi32, #tpu.memory_space<smem>>, %arg3: memref<2xi32, #tpu.memory_space<smem>>, %arg4: memref<2xi32, #tpu.memory_space<smem>>) -> (i32, i32) {
    %c1_i32 = arith.constant 1 : i32
    %0 = arith.muli %arg0, %c1_i32 : i32
    %1 = arith.addi %0, %arg1 : i32
    %c0_i32 = arith.constant 0 : i32
    %c0_i32_0 = arith.constant 0 : i32
    return %1, %c0_i32 : i32, i32
  }
  func.func @transform_5(%arg0: i32, %arg1: i32, %arg2: memref<3xi32, #tpu.memory_space<smem>>, %arg3: memref<2xi32, #tpu.memory_space<smem>>, %arg4: memref<2xi32, #tpu.memory_space<smem>>) -> (i32, i32) {
    %c0_i32 = arith.constant 0 : i32
    %c0_i32_0 = arith.constant 0 : i32
    return %arg0, %c0_i32 : i32, i32
  }
}

</mosaic_0001>

<bundles_post_ra>
// kernel: custom-call.7
= control target key start
LH: loop header
LB: loop body
LE: loop exit
PB: predicated region body
PF: predicated region fallthrough
CT: control target
= control target key end

     0   :  { %s6_s0 = inlined_call_operand.vmem [shape: u32[2], index: 0, kind: output, shape index: {}]  }

// kernel: sub.5
= control target key start
LH: loop header
LB: loop body
LE: loop exit
PB: predicated region body
PF: predicated region fallthrough
CT: control target
= control target key end

     0   :  { %s56_s0 = inlined_call_operand.vmem [shape: f32[16,3], index: 0, kind: input, shape index: {}]   ;;  %s57_s1 = inlined_call_operand.vmem [shape: f32[16,3], index: 1, kind: input, shape index: {}]   ;;  %s58_s2 = inlined_call_operand.vmem [shape: f32[16,3], index: 2, kind: output, shape index: {}]  }
   0x1   :  { %v3_v0 = vld [vmem:[%s56_s0] sm:$0xff]  ;;  %v20_v2 = vld [vmem:[%s56_s0 + $0x8] sm:$0xff] }
   0x2   :  { %v4_v1 = vld [vmem:[%s57_s1] sm:$0xff]  ;;  %v21_v4 = vld [vmem:[%s57_s1 + $0x8] sm:$0xff] }
   0x3   :  { %v7_v3 = vsub.f32 %v3_v0, %v4_v1  ;;  %v16_v5 = vsub.f32 %v20_v2, %v21_v4 }
   0x5   :  { %9 = vst [vmem:[%s58_s2] sm:$0xff] %v7_v3  ;;  %22 = vst [vmem:[%s58_s2 + $0x8] sm:$0xff] %v16_v5 }

// kernel: harmonic_energy.1
= control target key start
LH: loop header
LB: loop body
LE: loop exit
PB: predicated region body
PF: predicated region fallthrough
CT: control target
= control target key end

     0   :  { %s1005_s0 = inlined_call_operand.vmem [shape: s32[3], index: 0, kind: input, shape index: {}]   ;;  %s1006_s3 = inlined_call_operand.vmem [shape: f32[64,128], index: 3, kind: input, shape index: {}]   ;;  %s1007_s4 = inlined_call_operand.vmem [shape: f32[64,128], index: 4, kind: input, shape index: {}]   ;;  %s1008_s5 = inlined_call_operand.vmem [shape: f32[64,128], index: 5, kind: input, shape index: {}]   ;;  %s1009_s6 = inlined_call_operand.vmem [shape: f32[64,128], index: 6, kind: input, shape index: {}]   ;;  %s1010_s7 = inlined_call_operand.vmem [shape: f32[64,128], index: 7, kind: input, shape index: {}]   ;;  %s1011_s8 = inlined_call_operand.vmem [shape: f32[16,128], index: 8, kind: output, shape index: {}]   ;;  %s1012_s1 = inlined_call_operand.vmem [shape: s32[2], index: 1, kind: input, shape index: {}]   ;;  %s1013_s2 = inlined_call_operand.vmem [shape: s32[2], index: 2, kind: input, shape index: {}]  }
   0x1   :  { %s13_s29 = sshll.u32 %s1005_s0, 4  ;;  %s17_s10 = sshll.u32 %s1012_s1, 4  ;;  %s14_s29 = int_to_ptr.vmem [resolvable:$true] %s13_s29  ;;  %s18_s10 = int_to_ptr.vmem [resolvable:$true] %s17_s10 }
   0x2   :  { %s729_s11 = scalar_lea.vmem %s14_s29, 16  ;;  %p734_p1 = scmp.lt.s32.totalorder %s14_s29, %s14_s29 }
   0x3   :  { %p730_p0 = scmp.ne.s32.totalorder %s14_s29, %s729_s11  ;;  %p735_p2 = scmp.lt.s32.totalorder %s729_s11, %s729_s11 }
   0x5   :  { %p736_p3 = por %p735_p2, %p734_p1 }
   0x7   :  { %p737_p4 = pnand %p736_p3, %p730_p0 }
   0x9   :  { %740 = shalt.err (!%p737_p4)  }
   0xa   :  { %s815_s12 = smov [#allocation3]   ;;  %s741_s13 = scalar_lea.vmem %s18_s10, 16 }
   0xb   :  { %16 = dma.vmem_to_smem %s14_s29, 16, %s815_s12, [#allocation2] }
   0xc   :  { %p742_p5 = scmp.ne.s32.totalorder %s18_s10, %s741_s13  ;;  %p746_p6 = scmp.lt.s32.totalorder %s18_s10, %s18_s10 }
   0xd   :  { %p747_p7 = scmp.lt.s32.totalorder %s741_s13, %s741_s13 }
   0xf   :  { %p748_p8 = por %p747_p7, %p746_p6 }
  0x11   :  { %p749_p9 = pnand %p748_p8, %p742_p5 }
  0x13   :  { %752 = shalt.err (!%p749_p9)  }
  0x14   :  { %s816_s0 = smov [#allocation4]   ;;  %s21_s15 = sshll.u32 %s1013_s2, 4  ;;  %s22_s15 = int_to_ptr.vmem [resolvable:$true] %s21_s15 }
  0x15   :  { %20 = dma.vmem_to_smem %s18_s10, 16, %s816_s0, [#allocation2] }
  0x16   :  { %s753_s16 = scalar_lea.vmem %s22_s15, 16  ;;  %p758_p11 = scmp.lt.s32.totalorder %s22_s15, %s22_s15 }
  0x17   :  { %p754_p10 = scmp.ne.s32.totalorder %s22_s15, %s753_s16  ;;  %p759_p12 = scmp.lt.s32.totalorder %s753_s16, %s753_s16 }
  0x19   :  { %p760_p13 = por %p759_p12, %p758_p11 }
  0x1b   :  { %p761_p0 = pnand %p760_p13, %p754_p10 }
  0x1d   :  { %764 = shalt.err (!%p761_p0)  }
  0x1e   :  { %s817_s17 = smov [#allocation5]  }
  0x1f   :  { %24 = dma.vmem_to_smem %s22_s15, 16, %s817_s17, [#allocation2] }
  0x20   :  { %789 = dma.done.wait [#allocation2], 48 }
  0x21   :  { %790 = vsyncadd [#allocation2], 4294967248 }
  0x22   :  { %26 = sfence }
  0x23   :  { %s873_s18 = smov 0   ;;  %s875_s19 = smov 0  }
  0x24   :  { %s877_s20 = smov 0  }
  0x25 LB: > { %s44_s2 = sadd.s32 1, %s797_s19  ;;  %p654_p1 = scmp.ge.s32.totalorder %s801_s20, 1  ;;  %s801_s20 = sphi %s877_s20, %s32_s20   ;;  %s797_s19 = sphi %s875_s19, %s1016_s19   ;;  %s793_s18 = sphi %s873_s18, %s1015_s18  }
  0x26   : > { %p46_p2 = scmp.ge.s32.totalorder %s44_s2, 2  ;;  %p281_p3 = scmp.lt.s32.totalorder %s801_s20, 3 }
  0x28   : > { %s1018_s2 = smov (%p46_p2, %s44_s2), 0  ;;  %p282_p4 = pnand %p654_p1, %p281_p3 }
  0x29   : > { %s655_s21 = sshll.u32 (!%p282_p4), %s793_s18, 2  ;;  %p373_p5 = scmp.lt.s32.totalorder (!%p282_p4), %s793_s18, 1 }
  0x2a   : > { %285 = sbr.rel (%p282_p4) target bundleno = 263 (0x107), region = 40  ;;  %p335_p6 = scmp.lt.s32.totalorder (!%p282_p4), %s655_s21, 7 }
  0x2b   : > { %s666_s22 = sshll.u32 (!%p282_p4), %s793_s18, 12  ;;  %s898_s25 = sld [smem:[#allocation4 + %s793_s18]] (!%p282_p4)  }
  0x2c   : > { %s923_s15 = sld [smem:[#allocation5 + %s793_s18]] (!%p282_p4) }
  0x2f   : > { %v463_v0 = vlaneseq  ;;  %s374_s23 = scalar_select %p373_p5, %s793_s18, 1  ;;  %v475_v2 = vstv %s666_s22  ;;  %v818_v7 = vmov 0.0  }
  0x30   : > { %s1020_s21 = smov (!%p335_p6, %s655_s21), 7 }
  0x31   : > { %v464_v1 = vshrl.u32 %v463_v0, 7  ;;  %s665_s24 = sshll.u32 %s374_s23, 3  ;;  %s900_s26 = sshll.u32 %s1020_s21, 3  ;;  %v920_v13 = vand.u32 127, %v463_v0 }
  0x32   : > { %s905_s29 = scalar_lea.vmem %s1011_s8, %s665_s24  ;;  %s338_s10 = scalar_lea.vmem %s1006_s3, %s900_s26 }
  0x33   : > { %v465_v3 = vadd.s32 8, %v464_v1  ;;  %v466_v4 = vadd.s32 16, %v464_v1  ;;  %v467_v5 = vadd.s32 24, %v464_v1  ;;  %v471_v6 = vmul.u32 128, %v464_v1  ;;  %s346_s13 = scalar_lea.vmem %s1007_s4, %s900_s26  ;;  %382 = vst [vmem:[%s905_s29] sm:$0xff] %v818_v7  ;;  %s354_s14 = scalar_lea.vmem %s1008_s5, %s900_s26  ;;  %v383_v10 = vld [vmem:[%s338_s10] sm:$0xff]  ;;  %v384_v11 = vld [vmem:[%s338_s10 + $0x8] sm:$0xff] }
  0x34   : > { %v385_v12 = vld [vmem:[%s338_s10 + $0x10] sm:$0xff]  ;;  %v386_v16 = vld [vmem:[%s338_s10 + $0x18] sm:$0xff]  ;;  %v387_v17 = vld [vmem:[%s346_s13] sm:$0xff]  ;;  %v395_v19 = vmul.f32 %v383_v10, %v383_v10  ;;  %v396_v20 = vmul.f32 %v384_v11, %v384_v11  ;;  %s486_s16 = sadd.s32 1, %s923_s15  ;;  %s942_s21 = scalar_lea.vmem %s1009_s6, %s900_s26 }
  0x35   : > { %v472_v8 = vmul.u32 128, %v465_v3  ;;  %v473_v9 = vmul.u32 128, %v466_v4  ;;  %v476_v15 = vadd.s32 %v475_v2, %v471_v6  ;;  %v388_v18 = vld [vmem:[%s346_s13 + $0x8] sm:$0xff]  ;;  %v397_v21 = vmul.f32 %v385_v12, %v385_v12  ;;  %v389_v23 = vld [vmem:[%s346_s13 + $0x10] sm:$0xff]  ;;  %v390_v24 = vld [vmem:[%s346_s13 + $0x18] sm:$0xff]  ;;  %s948_s24 = scalar_lea.vmem %s1010_s7, %s900_s26  ;;  %p591_p7 = scmp.ge.s32.totalorder %s898_s25, %s486_s16 }
  0x36   : > { %v474_v14 = vmul.u32 128, %v467_v5  ;;  %v391_v25 = vld [vmem:[%s354_s14] sm:$0xff]  ;;  %v398_v26 = vmul.f32 %v386_v16, %v386_v16  ;;  %v399_v27 = vmul.f32 %v387_v17, %v387_v17  ;;  %v400_v28 = vmul.f32 %v388_v18, %v388_v18  ;;  %v392_v30 = vld [vmem:[%s354_s14 + $0x8] sm:$0xff]  ;;  %v393_v31 = vld [vmem:[%s354_s14 + $0x10] sm:$0xff] }
  0x37   : > { %v477_v22 = vadd.s32 %v475_v2, %v472_v8  ;;  %v478_v29 = vadd.s32 %v475_v2, %v473_v9  ;;  %v394_v32 = vld [vmem:[%s354_s14 + $0x18] sm:$0xff]  ;;  %v401_v33 = vmul.f32 %v389_v23, %v389_v23  ;;  %v402_v34 = vmul.f32 %v390_v24, %v390_v24  ;;  %v443_v60 = vld [vmem:[%s942_s21] sm:$0xff]  ;;  %v444_v1 = vld [vmem:[%s942_s21 + $0x8] sm:$0xff] }
  0x38   : > { %v407_v35 = vmul.f32 %v391_v25, %v391_v25  ;;  %v479_v36 = vadd.s32 %v475_v2, %v474_v14  ;;  %v403_v37 = vadd.f32 %v399_v27, %v395_v19  ;;  %v404_v38 = vadd.f32 %v400_v28, %v396_v20  ;;  %v445_v5 = vld [vmem:[%s942_s21 + $0x10] sm:$0xff]  ;;  %v451_v6 = vld [vmem:[%s948_s24] sm:$0xff]  ;;  %v446_v9 = vld [vmem:[%s942_s21 + $0x18] sm:$0xff] }
  0x39   : > { %v408_v39 = vmul.f32 %v392_v30, %v392_v30  ;;  %v409_v40 = vmul.f32 %v393_v31, %v393_v31  ;;  %v405_v41 = vadd.f32 %v401_v33, %v397_v21  ;;  %v406_v42 = vadd.f32 %v402_v34, %v398_v26  ;;  %v452_v11 = vld [vmem:[%s948_s24 + $0x8] sm:$0xff]  ;;  %v453_v16 = vld [vmem:[%s948_s24 + $0x10] sm:$0xff]  ;;  %v454_v19 = vld [vmem:[%s948_s24 + $0x18] sm:$0xff] }
  0x3a   : > { %v410_v43 = vmul.f32 %v394_v32, %v394_v32  ;;  %v926_v44 = vadd.s32 %v476_v15, %v920_v13  ;;  %v411_v45 = vadd.f32 %v407_v35, %v403_v37  ;;  %v929_v47 = vadd.s32 %v477_v22, %v920_v13 }
  0x3b   : > { %v412_v46 = vadd.f32 %v408_v39, %v404_v38  ;;  %v932_v48 = vadd.s32 %v478_v29, %v920_v13  ;;  %v413_v49 = vadd.f32 %v409_v40, %v405_v41  ;;  %v935_v51 = vadd.s32 %v479_v36, %v920_v13 }
  0x3c   : > { %v414_v50 = vadd.f32 %v410_v43, %v406_v42  ;;  %721 = vrsqrt.f32 %v411_v45  ;;  %vm417_vm0 = vcmp.eq.f32.partialorder %v411_v45, inf  ;;  %vm419_vm1 = vcmp.eq.f32.partialorder %v411_v45, 0.0 }
  0x3d   : > { %723 = vrsqrt.f32 %v412_v46  ;;  %v420_v53 = vand.u32 2147483648, %v411_v45  ;;  %vm424_vm2 = vcmp.eq.f32.partialorder %v412_v46, inf  ;;  %vm426_vm3 = vcmp.eq.f32.partialorder %v412_v46, 0.0 }
  0x3e   : > { %725 = vrsqrt.f32 %v413_v49  ;;  %v427_v56 = vand.u32 2147483648, %v412_v46  ;;  %vm431_vm4 = vcmp.eq.f32.partialorder %v413_v49, inf  ;;  %vm433_vm5 = vcmp.eq.f32.partialorder %v413_v49, 0.0 }
  0x3f   : > { %727 = vrsqrt.f32 %v414_v50  ;;  %v434_v59 = vand.u32 2147483648, %v413_v49  ;;  %vm438_vm6 = vcmp.eq.f32.partialorder %v414_v50, inf  ;;  %v441_v0 = vand.u32 2147483648, %v414_v50 }
  0x40   : > { %vm440_vm7 = vcmp.eq.f32.partialorder %v414_v50, 0.0  ;;  %v811_v29 = vmov 0.0  }
  0x49   : > { %v722_v52 = vpop.eup %721 }
  0x4a   : > { %v724_v54 = vpop.eup %723  ;;  %v416_v55 = vmul.f32 %v722_v52, %v411_v45 }
  0x4b   : > { %v726_v57 = vpop.eup %725  ;;  %v423_v58 = vmul.f32 %v724_v54, %v412_v46 }
  0x4c   : > { %v728_v61 = vpop.eup %727  ;;  %v418_v62 = vsel %vm417_vm0, %v411_v45, %v416_v55  ;;  %v430_v63 = vmul.f32 %v726_v57, %v413_v49 }
  0x4d   : > { %v421_v2 = vsel %vm419_vm1, %v420_v53, %v418_v62  ;;  %v425_v3 = vsel %vm424_vm2, %v412_v46, %v423_v58  ;;  %v437_v4 = vmul.f32 %v728_v61, %v414_v50 }
  0x4e   : > { %v428_v7 = vsel %vm426_vm3, %v427_v56, %v425_v3  ;;  %v432_v8 = vsel %vm431_vm4, %v413_v49, %v430_v63  ;;  %v447_v10 = vsub.f32 %v421_v2, %v443_v60 }
  0x4f   : > { %v435_v12 = vsel %vm433_vm5, %v434_v59, %v432_v8  ;;  %v439_v14 = vsel %vm438_vm6, %v414_v50, %v437_v4  ;;  %v448_v15 = vsub.f32 %v428_v7, %v444_v1 }
  0x50   : > { %v442_v17 = vsel %vm440_vm7, %v441_v0, %v439_v14  ;;  %v449_v18 = vsub.f32 %v435_v12, %v445_v5  ;;  %v455_v20 = vmul.f32 %v451_v6, %v447_v10 }
  0x51   : > { %v450_v21 = vsub.f32 %v442_v17, %v446_v9  ;;  %v456_v22 = vmul.f32 %v452_v11, %v448_v15  ;;  %593 = sbr.rel (%p591_p7) target bundleno = 259 (0x103), region = 87 }
  0x52   : > { %v457_v23 = vmul.f32 %v453_v16, %v449_v18  ;;  %v459_v24 = vmul.f32 %v455_v20, %v447_v10 }
  0x53   : > { %v458_v25 = vmul.f32 %v454_v19, %v450_v21  ;;  %v460_v26 = vmul.f32 %v456_v22, %v448_v15 }
  0x54   : > { %v461_v27 = vmul.f32 %v457_v23, %v449_v18 }
  0x55   : > { %v462_v28 = vmul.f32 %v458_v25, %v450_v21 }
  0x56   : > { %v803_v30 = vmov 0.0  }
  0x57 LB: >> { %s494_s26 = sld [smem:[#allocation3 + %s809_s25]]  ;;  %s975_s27 = sadd.s32 1, %s809_s25   ;;  %v526_v49 = vstv %s809_s25  ;;  %s809_s25 = sphi %s898_s25, %s1014_s25   ;;  %v805_v30 = vphi %v803_v30, %v804_v30  }
  0x58   : >> { %s496_s28 = sld [smem:[#allocation3 + %s975_s27]]  ;;  %vm527_vm4 = vcmp.eq.s32.totalorder %v920_v13, %v526_v49  ;;  %p489_p8 = scmp.ge.s32.totalorder %s975_s27, %s486_s16 }
  0x59   : >> { %s1014_s25 = smov %s975_s27 }
  0x5d   : >> { %v497_v31 = vstv %s494_s26 }
  0x5e   : >> { %vm498_vm8 = vcmp.ge.s32.totalorder %v926_v44, %v497_v31  ;;  %vm499_vm9 = vcmp.ge.s32.totalorder %v929_v47, %v497_v31  ;;  %v502_v32 = vstv %s496_s28  ;;  %vm500_vm10 = vcmp.ge.s32.totalorder %v932_v48, %v497_v31 }
  0x5f   : >> { %vm503_vm11 = vcmp.lt.s32.totalorder %v926_v44, %v502_v32  ;;  %vm504_vm12 = vcmp.lt.s32.totalorder %v929_v47, %v502_v32  ;;  %vm505_vm13 = vcmp.lt.s32.totalorder %v932_v48, %v502_v32  ;;  %vm501_vm14 = vcmp.ge.s32.totalorder %v935_v51, %v497_v31 }
  0x60   : >> { %vm506_vm15 = vcmp.lt.s32.totalorder %v935_v51, %v502_v32  ;;  %vm507_vm0 = vmand %vm498_vm8, %vm503_vm11 }
  0x61   : >> { %vm508_vm1 = vmand %vm499_vm9, %vm504_vm12  ;;  %v511_v33 = vsel %vm507_vm0, %v459_v24, 0.0 }
  0x62   : >> { %vm509_vm2 = vmand %vm500_vm10, %vm505_vm13  ;;  %v512_v34 = vsel %vm508_vm1, %v460_v26, 0.0 }
  0x63   : >> { %vm510_vm3 = vmand %vm501_vm14, %vm506_vm15  ;;  %v513_v35 = vsel %vm509_vm2, %v461_v27, 0.0  ;;  %v515_v36 = vadd.f32 %v512_v34, %v511_v33 }
  0x64   : >> { %v514_v37 = vsel %vm510_vm3, %v462_v28, 0.0 }
  0x65   : >> { %v516_v38 = vadd.f32 %v515_v36, %v513_v35 }
  0x67   : >> { %v517_v39 = vadd.f32 %v516_v38, %v514_v37 }
  0x69   : >> { %v518_v40 = vrot.slane %v517_v39, 4 }
  0x6b   : >> { %v519_v41 = vadd.f32 %v518_v40, %v517_v39 }
  0x6d   : >> { %v520_v42 = vrot.slane %v519_v41, 2 }
  0x6f   : >> { %v521_v43 = vadd.f32 %v520_v42, %v519_v41 }
  0x71   : >> { %v522_v45 = vrot.slane %v521_v43, 1 }
  0x73   : >> { %v523_v46 = vadd.f32 %v522_v45, %v521_v43 }
  0x75   : >> { %524 = vadd.xlane.f32.xlu0 %v523_v46 }
  0xfe   : >> { %v525_v50 = vpop.xlane.xlu0 %524  ;;  %492 = sbr.rel (!%p489_p8) target bundleno = 87 (0x57), region = 93 }
  0xff   : >> { %v528_v52 = vsel %vm527_vm4, %v525_v50, 0.0 }
 0x100   : >> { %v529_v53 = vadd.f32 %v805_v30, %v528_v52  }
 0x102   : >> { %v804_v30 = vmov %v529_v53   ;;  %v812_v29 = vmov (%p489_p8), %v529_v53  }
 0x103 PF: > { %v530_v54 = vld [vmem:[%s905_s29] sm:$0xff]  ;;  %v813_v29 = vphi %v811_v29, %v812_v29  }
 0x104   : > { %v531_v55 = vadd.f32 %v813_v29, %v530_v54 }
 0x106   : > { %532 = vst [vmem:[%s905_s29] sm:$0xff] %v531_v55 }
 0x107 PF: > { %s32_s20 = sadd.s32 1, %s801_s20   ;;  %s1015_s18 = smov %s797_s19 }
 0x108   : > { %p29_p9 = scmp.ge.s32.totalorder %s32_s20, 4   ;;  %s1016_s19 = smov %s1018_s2 }
 0x10a   :  { %31 = sbr.rel (!%p29_p9) target bundleno = 37 (0x25), region = 104 }

</bundles_post_ra>
